<compile_context>
chip_gen: v5e
topology: v5e:2x2
jax: 0.10.0
libtpu: 0.0.40
codegen_flags: <defaults>
</compile_context>

<pallas_src>
import math
import numpy as np
import jax
import jax.numpy as jnp
from jax.experimental import pallas as pl
from jax.experimental.pallas import tpu as pltpu

_LANES = 128  # TPU vreg lane width


def build_positional_encoding(hidden_size: int, max_seq_len: int = 1000) -> np.ndarray:
    """Replicates the exact final state of the torch double loop (whole-column
    assignment: only the last `pos` value survives, every row is identical)."""
    assert hidden_size % 2 == 0, "hidden_size must be even (torch code indexes i+1)"
    encode = np.zeros((max_seq_len, hidden_size), dtype=np.float32)
    last_pos = max_seq_len - 1
    for i in range(0, hidden_size, 2):
        tmp = last_pos / 10000 ** (i / hidden_size)
        encode[:, i] = math.sin(tmp)
        encode[:, i + 1] = math.cos(tmp)
    return encode


def _pos_add_kernel(x_ref, pe_ref, o_ref):
    # x_ref: (block_rows, L); pe_ref: (1, L) -> sublane broadcast; pure VPU add.
    o_ref[...] = x_ref[...] + pe_ref[...]


def _pick_block_rows(rows: int, lanes: int, itemsize: int,
                     budget_bytes: int = 4 * 1024 * 1024) -> int:
    """Largest dtype-aware sublane-multiple row block under ~4 MiB per buffer.
    No exact-divisor requirement: the grid uses cdiv and Pallas pads the ragged
    last block.  If everything fits in one block, split into >=2 blocks so both
    v7x TensorCores get work (no-op on single-TC v5e/v6e)."""
    sub = max(8, 32 // itemsize)          # 8 for f32, 16 for bf16, 32 for int8/fp8
    max_rows = max(sub, (budget_bytes // (lanes * itemsize)) // sub * sub)
    if rows <= max_rows:
        if rows >= 2 * sub:
            half = -(-rows // 2)          # cdiv(rows, 2)
            return -(-half // sub) * sub  # round up to sublane multiple
        return rows                       # full-extent block (always legal)
    return max_rows


def _lane_dense_add(x2d: jax.Array, pe_lane: jax.Array) -> jax.Array:
    rows, lanes = x2d.shape
    itemsize = x2d.dtype.itemsize
    block_rows = _pick_block_rows(rows, lanes, itemsize)
    grid = (pl.cdiv(rows, block_rows),)
    pe2d = pe_lane.reshape(1, lanes).astype(x2d.dtype)

    return pl.pallas_call(
        _pos_add_kernel,
        out_shape=jax.ShapeDtypeStruct((rows, lanes), x2d.dtype),
        grid_spec=pltpu.PrefetchScalarGridSpec(
            num_scalar_prefetch=0,
            grid=grid,
            in_specs=[
                pl.BlockSpec((block_rows, lanes), lambda i: (i, 0)),  # x tile
                pl.BlockSpec((1, lanes), lambda i: (0, 0)),           # shared PE row
            ],
            out_specs=pl.BlockSpec((block_rows, lanes), lambda i: (i, 0)),
        ),
        compiler_params=pltpu.CompilerParams(
            dimension_semantics=("parallel",),   # elementwise: no reduction axis
            vmem_limit_bytes=32 * 1024 * 1024,   # 4 bufs x 4 MiB + PE row fits easily
        ),
        # Memory-bound streaming add: read + write, one flop per element.
        cost_estimate=pl.CostEstimate(
            flops=rows * lanes,
            transcendentals=0,
            bytes_accessed=2 * rows * lanes * itemsize + lanes * itemsize,
        ),
        # In-place add on x's buffer: no separate output allocation / copy.
        input_output_aliases={0: 0},
    )(x2d, pe2d)


def positional_encoder_forward(x: jax.Array, pos_enc: jax.Array) -> jax.Array:
    """x: (B, S, H); pos_enc: (max_seq_len, H). Returns x + pos_enc[:S] (broadcast over B)."""
    B, S, H = x.shape
    max_seq_len = pos_enc.shape[0]
    if S > max_seq_len:
        raise ValueError(f"seq_len {S} exceeds max_seq_len {max_seq_len}")

    # Every row of pos_enc is identical (faithful column-assignment), so one row suffices.
    pe_row = pos_enc[0, :].astype(x.dtype)

    # Lane-dense slab: L = lcm(H, 128) is a multiple of both H and 128, so each
    # L-wide row starts at a hidden-index-0 boundary and PE tiles exactly.
    L = math.lcm(H, _LANES)
    pe_lane = jnp.tile(pe_row, L // H)

    total = B * S * H
    rows = -(-total // L)          # cdiv
    padded = rows * L

    x_flat = x.reshape(total)
    if padded != total:
        x_flat = jnp.pad(x_flat, (0, padded - total))
    x2d = x_flat.reshape(rows, L)

    out2d = _lane_dense_add(x2d, pe_lane)

    out_flat = out2d.reshape(padded)
    if padded != total:
        out_flat = out_flat[:total]
    return out_flat.reshape(B, S, H)


if __name__ == "__main__":
    key = jax.random.PRNGKey(0)

    # Primary shapes implied by the forward: batch=2, seq=8, hidden=32.
    B, S, H = 2, 8, 32
    max_seq_len = 1000
    pos_enc_np = build_positional_encoding(H, max_seq_len)
    pos_enc = jnp.asarray(pos_enc_np)
    x = jax.random.normal(key, (B, S, H), dtype=jnp.float32)

    out = jax.block_until_ready(positional_encoder_forward(x, pos_enc))
    ref = np.asarray(x) + pos_enc_np[None, :S, :]
    np.testing.assert_allclose(np.asarray(out), ref, rtol=1e-6, atol=1e-6)

    # Secondary check: awkward H (not a divisor/multiple of 128) + ragged total,
    # exercising the lcm lane-densify + padding path.
    B2, S2, H2 = 2, 5, 48
    pos_enc2_np = build_positional_encoding(H2, max_seq_len)
    pos_enc2 = jnp.asarray(pos_enc2_np)
    x2 = jax.random.normal(jax.random.PRNGKey(1), (B2, S2, H2), dtype=jnp.float32)

    out2 = jax.block_until_ready(positional_encoder_forward(x2, pos_enc2))
    ref2 = np.asarray(x2) + pos_enc2_np[None, :S2, :]
    np.testing.assert_allclose(np.asarray(out2), ref2, rtol=1e-6, atol=1e-6)

    print("KERNEL_OK")
</pallas_src>

<mosaic_0001>
module attributes {stable_mosaic.version = 11 : i64} {
  func.func @_pos_add_kernel(%arg0: i32, %arg1: memref<4x128xf32, #tpu.memory_space<vmem>>, %arg2: memref<1x128xf32, #tpu.memory_space<vmem>>, %arg3: memref<4x128xf32, #tpu.memory_space<vmem>>) attributes {dimension_semantics = [#tpu.dimension_semantics<parallel>], iteration_bounds = array<i64: 1>, scalar_prefetch = 0 : i64, scratch_operands = 0 : i64, tpu.core_type = #tpu.core_type<tc>, window_params = [{transform_indices = @transform_0, window_bounds = array<i64: 4, 128>}, {pipeline_mode = #tpu.pipeline_mode<synchronous>, transform_indices = @transform_1, window_bounds = array<i64: 1, 128>}, {transform_indices = @transform_2, window_bounds = array<i64: 4, 128>}]} {
    %c0 = arith.constant 0 : index
    %c0_0 = arith.constant 0 : index
    %0 = vector.load %arg1[%c0, %c0_0] : memref<4x128xf32, #tpu.memory_space<vmem>>, vector<4x128xf32>
    %c0_1 = arith.constant 0 : index
    %c0_2 = arith.constant 0 : index
    %1 = vector.load %arg2[%c0_1, %c0_2] : memref<1x128xf32, #tpu.memory_space<vmem>>, vector<1x128xf32>
    %2 = vector.broadcast %1 : vector<1x128xf32> to vector<4x128xf32>
    %3 = arith.addf %0, %2 : vector<4x128xf32>
    %c0_3 = arith.constant 0 : index
    %c0_4 = arith.constant 0 : index
    %4 = vector.load %arg3[%c0_3, %c0_4] : memref<4x128xf32, #tpu.memory_space<vmem>>, vector<4x128xf32>
    tpu.vector_store %arg3[%c0_3, %c0_4], %3 {strides = array<i32>} : memref<4x128xf32, #tpu.memory_space<vmem>>, vector<4x128xf32>,
    return
  }
  func.func @transform_0(%arg0: i32) -> (i32, i32) {
    %c0_i32 = arith.constant 0 : i32
    %c0_i32_0 = arith.constant 0 : i32
    return %arg0, %c0_i32 : i32, i32
  }
  func.func @transform_1(%arg0: i32) -> (i32, i32) {
    %c0_i32 = arith.constant 0 : i32
    %c0_i32_0 = arith.constant 0 : i32
    %c0_i32_1 = arith.constant 0 : i32
    return %c0_i32, %c0_i32_0 : i32, i32
  }
  func.func @transform_2(%arg0: i32) -> (i32, i32) {
    %c0_i32 = arith.constant 0 : i32
    %c0_i32_0 = arith.constant 0 : i32
    return %arg0, %c0_i32 : i32, i32
  }
}

</mosaic_0001>

<bundles_post_ra>
// kernel: tpu_custom_call.1
= control target key start
LH: loop header
LB: loop body
LE: loop exit
PB: predicated region body
PF: predicated region fallthrough
CT: control target
= control target key end

     0   :  { %7 = vsyncpa [#allocation3], 0  ;;  %s131_s0 = inlined_call_operand.hbm [shape: f32[4,128], index: 0, kind: input, shape index: {}, may-alias: {0,2}]   ;;  %s132_s1 = inlined_call_operand.vmem [shape: f32[1,128], index: 1, kind: input, shape index: {}]   ;;  %s133_s2 = inlined_call_operand.hbm [shape: f32[4,128], index: 2, kind: output, shape index: {}, may-alias: {0,2}]  }
   0x1   :  { %8 = vsyncpa [#allocation4], 0  ;;  %s14_s11 = sshll.u32 %s131_s0, 4  ;;  %s105_s12 = smov [#allocation2]   ;;  %s15_s11 = int_to_ptr.hbm [resolvable:$true] %s14_s11 }
   0x2   :  { %s16_s13 = sshll.u32 %s105_s12, 4  ;;  %s17_s13 = int_to_ptr.vmem [resolvable:$true] %s16_s13 }
   0x3   :  { %19 = dma.hbm_to_vmem [thread:$0]  %s15_s11, 64, %s17_s13, [#allocation3]  }
   0x4   :  { %101 = dma.done.wait [#allocation3], 64  }
   0x5   :  { %102 = vsyncadd [#allocation3], 4294967232  ;;  %s106_s14 = smov [#allocation5]   ;;  %s40_s18 = sshll.u32 %s133_s2, 4  ;;  %v26_v0 = vld [vmem:[#allocation2] sm:$0xf]  ;;  %s41_s18 = int_to_ptr.hbm [resolvable:$true] %s40_s18 }
   0x6   :  { %s38_s15 = sshll.u32 %s106_s14, 4  ;;  %v52_v1 = vld [vmem:[%s132_s1] ss:$0 sm:$0xff]  ;;  %s39_s15 = int_to_ptr.vmem [resolvable:$true] %s38_s15 }
   0x7   :  { %v31_v2 = vadd.f32 %v52_v1, %v26_v0 }
   0x9   :  { %32 = vst [vmem:[#allocation5] sm:$0xf] %v31_v2 }
   0xa   :  { %43 = dma.vmem_to_hbm [thread:$0]  %s39_s15, 64, %s41_s18, [#allocation4]  }
   0xb   :  { %103 = dma.done.wait [#allocation4], 64  }
   0xc   :  { %104 = vsyncadd [#allocation4], 4294967232 }
   0xd   :  { %48 = vsyncpa [#allocation3], 1 }
   0xe   :  { %49 = vsyncpa [#allocation4], 1 }

</bundles_post_ra>
